<compile_context>
chip_gen: v5e
topology: v5e:2x2
jax: 0.10.0
libtpu: 0.0.40
codegen_flags: <defaults>
</compile_context>

<pallas_src>
import jax
import jax.numpy as jnp
from jax import lax
from jax.experimental import pallas as pl
from jax.experimental.pallas import tpu as pltpu


# Crossover between the VPU-select gather and the one-hot MXU matmul gather:
# V selects over the (R, D) tile cost ~V*R*D/4 VALU element-ops, which stays
# below the HBM store time only for small V; the padded MXU matmul is cheap
# and HBM-bound for any V, so switch once V grows.
_SELECT_MAX_V = 16


def prompt_embedding_kernel(idx_ref, emb_ref, out_ref):
    # idx_ref: VMEM (R, 1)  int32  -- flattened (batch*token) indices for this tile
    # emb_ref: VMEM (V, D)  f32    -- full prompt embedding table (grid-invariant)
    # out_ref: VMEM (R, D)  f32    -- gathered prompt embeddings, lane-dense slab
    R = idx_ref.shape[0]
    V, D = emb_ref.shape

    idx = idx_ref[...]                                   # (R, 1) int32
    tab = emb_ref[...]                                   # (V, D)

    if V <= _SELECT_MAX_V:
        # VPU path: V unrolled vreg-wide selects; exact, no one-hot, no MXU.
        acc = jnp.zeros((R, D), jnp.float32)
        for v in range(V):                               # unrolled at trace time
            hit = idx == v                               # (R, 1) bool, lane-broadcast
            acc = jnp.where(hit, tab[v][None, :].astype(jnp.float32), acc)
        gathered = acc
    else:
        # MXU path: one flattened (R, V) x (V, D) matmul of a 0/1 one-hot.
        iota = lax.broadcasted_iota(jnp.int32, (R, V), 1)
        onehot = (iota == idx).astype(jnp.float32)       # (R, V); OOB idx -> zero row
        gathered = jnp.dot(
            onehot,
            tab.astype(jnp.float32),
            precision=lax.Precision.HIGHEST,             # keep the gather exact in f32
            preferred_element_type=jnp.float32,
        )

    # Single unmasked full-width store of the whole 2D tile.
    out_ref[...] = gathered.astype(out_ref.dtype)


def _choose_block_b(B, T, D, itemsize):
    """Pick a batch tile that (a) divides B, (b) keeps each double-buffered
    output tile within a conservative VMEM budget (fits v5e 16 MiB scoped /
    v7x 64 MiB physical), (c) keeps the flattened row count a multiple of 8
    for unmasked stores, and (d) gives >= 2 grid steps when the output is big
    (pipelining + v7x two-TensorCore sharding)."""
    out_buf_budget = 4 << 20                             # bytes per output buffer
    max_rows = max(1, out_buf_budget // max(1, T * D * itemsize))
    divisors = [d for d in range(1, B + 1) if B % d == 0]
    ok = [d for d in divisors if d <= max_rows and ((d * T) % 8 == 0 or d == B)]
    if not ok:
        # Degenerate tiny/odd shapes: one step over the whole batch
        # (full-extent block is always layout-legal).
        return B
    block_b = max(ok)
    if block_b == B and B * T * D * itemsize > (2 << 20):
        smaller = [d for d in ok if d < B]
        if smaller:
            block_b = max(smaller)
    return block_b


def _pallas_gather(idx2d, weight, *, block_rows, grid_b, single_buffer_table):
    BT, _ = idx2d.shape
    V, D = weight.shape
    itemsize = jnp.dtype(weight.dtype).itemsize

    table_kwargs = {}
    if single_buffer_table:
        # Grid-invariant block: double-buffering it only burns VMEM.
        table_kwargs["pipeline_mode"] = pl.Buffered(1)

    cost = pl.CostEstimate(
        flops=0 if V <= _SELECT_MAX_V else 2 * BT * V * D,
        transcendentals=0,
        bytes_accessed=BT * D * itemsize + V * D * itemsize + BT * 4,
    )

    return pl.pallas_call(
        prompt_embedding_kernel,
        out_shape=jax.ShapeDtypeStruct((BT, D), weight.dtype),
        grid=(grid_b,),
        in_specs=[
            # flattened index column for this batch tile
            pl.BlockSpec((block_rows, 1), lambda b: (b, 0)),
            # whole embedding table resident in VMEM (grid-invariant)
            pl.BlockSpec((V, D), lambda b: (0, 0), **table_kwargs),
        ],
        out_specs=pl.BlockSpec((block_rows, D), lambda b: (b, 0)),
        compiler_params=pltpu.CompilerParams(dimension_semantics=("parallel",)),
        cost_estimate=cost,
    )(idx2d, weight)


def prompt_embedding(indices, embedding_weight, *, block_b=None):
    """indices: (B, T) int; embedding_weight: (V, D) f32 -> (B, T, D) f32.

    NOTE: out-of-range / negative indices yield all-zero rows instead of
    raising (torch.nn.Embedding would error)."""
    indices = indices.astype(jnp.int32)  # TPU wants int32 (torch callers pass int64)
    B, T = indices.shape
    V, D = embedding_weight.shape
    itemsize = jnp.dtype(embedding_weight.dtype).itemsize

    if block_b is None:
        block_b = _choose_block_b(B, T, D, itemsize)
    grid_b = pl.cdiv(B, block_b)
    block_rows = block_b * T

    idx2d = indices.reshape(B * T, 1)                    # lane dim 1 == full extent

    try:
        out2d = _pallas_gather(idx2d, embedding_weight, block_rows=block_rows,
                               grid_b=grid_b, single_buffer_table=True)
    except Exception:
        # pipeline_mode=pl.Buffered(1) not supported on this jax build:
        # fall back to the default double-buffered (still correct) spec.
        out2d = _pallas_gather(idx2d, embedding_weight, block_rows=block_rows,
                               grid_b=grid_b, single_buffer_table=False)

    return out2d.reshape(B, T, D)                        # free reshape in XLA


if __name__ == "__main__":
    # Config (small, consistent with the module):
    #   num_virtual_tokens = 8, num_transformer_submodules = 1
    #   => total_virtual_tokens V = T = 8 ; token_dim D = 128 ; batch B = 2
    B, T, D = 2, 8, 128
    V = T  # nn.Embedding(total_virtual_tokens, token_dim)

    key = jax.random.PRNGKey(0)
    k_w, k_idx = jax.random.split(key)

    # Deterministic parameter init (PromptTuningInit.RANDOM-style).
    embedding_weight = (jax.random.normal(k_w, (V, D), dtype=jnp.float32)
                        * jnp.float32(0.02))

    # Input: (batch_size, total_virtual_tokens) indices into the prompt table.
    indices = jax.random.randint(k_idx, (B, T), 0, V, dtype=jnp.int32)

    out = prompt_embedding(indices, embedding_weight)
    out = jax.block_until_ready(out)

    # Reference: plain gather (same semantics as torch.nn.Embedding forward).
    ref = jnp.take(embedding_weight, indices, axis=0)
    assert out.shape == (B, T, D), out.shape
    assert out.dtype == jnp.float32
    assert jnp.allclose(out, ref, atol=1e-6), "mismatch vs reference gather"

    print("KERNEL_OK")
</pallas_src>

<mosaic_0001>
module attributes {stable_mosaic.version = 11 : i64} {
  func.func @prompt_embedding_kernel(%arg0: i32, %arg1: memref<16x1xi32, #tpu.memory_space<vmem>>, %arg2: memref<8x128xf32, #tpu.memory_space<vmem>>, %arg3: memref<16x128xf32, #tpu.memory_space<vmem>>) attributes {dimension_semantics = [#tpu.dimension_semantics<parallel>], iteration_bounds = array<i64: 1>, scalar_prefetch = 0 : i64, scratch_operands = 0 : i64, tpu.core_type = #tpu.core_type<tc>, window_params = [{transform_indices = @transform_0, window_bounds = array<i64: 16, 1>}, {pipeline_mode = #tpu.pipeline_mode<synchronous>, transform_indices = @transform_1, window_bounds = array<i64: 8, 128>}, {transform_indices = @transform_2, window_bounds = array<i64: 16, 128>}]} {
    %c0 = arith.constant 0 : index
    %c0_0 = arith.constant 0 : index
    %0 = vector.load %arg1[%c0, %c0_0] : memref<16x1xi32, #tpu.memory_space<vmem>>, vector<16x1xi32>
    %c0_1 = arith.constant 0 : index
    %c0_2 = arith.constant 0 : index
    %1 = vector.load %arg2[%c0_1, %c0_2] : memref<8x128xf32, #tpu.memory_space<vmem>>, vector<8x128xf32>
    %cst = arith.constant 0.000000e+00 : f32
    %2 = vector.broadcast %cst : f32 to vector<16x128xf32>
    %c0_i32 = arith.constant 0 : i32
    %3 = vector.broadcast %c0_i32 : i32 to vector<16x1xi32>
    %4 = arith.cmpi eq, %0, %3 : vector<16x1xi32>
    %5 = vector.extract_strided_slice %1 {offsets = [0, 0], sizes = [1, 128], strides = [1, 1]} : vector<8x128xf32> to vector<1x128xf32>
    %6 = vector.shape_cast %5 : vector<1x128xf32> to vector<128xf32>
    %7 = vector.shape_cast %6 : vector<128xf32> to vector<1x128xf32>
    %8 = vector.shape_cast %4 : vector<16x1xi1> to vector<16x1xi1>
    %9 = vector.broadcast %8 : vector<16x1xi1> to vector<16x128xi1>
    %10 = vector.shape_cast %7 : vector<1x128xf32> to vector<1x128xf32>
    %11 = vector.broadcast %10 : vector<1x128xf32> to vector<16x128xf32>
    %12 = arith.select %9, %11, %2 : vector<16x128xi1>, vector<16x128xf32>
    %c1_i32 = arith.constant 1 : i32
    %13 = vector.broadcast %c1_i32 : i32 to vector<16x1xi32>
    %14 = arith.cmpi eq, %0, %13 : vector<16x1xi32>
    %15 = vector.extract_strided_slice %1 {offsets = [1, 0], sizes = [1, 128], strides = [1, 1]} : vector<8x128xf32> to vector<1x128xf32>
    %16 = vector.shape_cast %15 : vector<1x128xf32> to vector<128xf32>
    %17 = vector.shape_cast %16 : vector<128xf32> to vector<1x128xf32>
    %18 = vector.shape_cast %14 : vector<16x1xi1> to vector<16x1xi1>
    %19 = vector.broadcast %18 : vector<16x1xi1> to vector<16x128xi1>
    %20 = vector.shape_cast %17 : vector<1x128xf32> to vector<1x128xf32>
    %21 = vector.broadcast %20 : vector<1x128xf32> to vector<16x128xf32>
    %22 = arith.select %19, %21, %12 : vector<16x128xi1>, vector<16x128xf32>
    %c2_i32 = arith.constant 2 : i32
    %23 = vector.broadcast %c2_i32 : i32 to vector<16x1xi32>
    %24 = arith.cmpi eq, %0, %23 : vector<16x1xi32>
    %25 = vector.extract_strided_slice %1 {offsets = [2, 0], sizes = [1, 128], strides = [1, 1]} : vector<8x128xf32> to vector<1x128xf32>
    %26 = vector.shape_cast %25 : vector<1x128xf32> to vector<128xf32>
    %27 = vector.shape_cast %26 : vector<128xf32> to vector<1x128xf32>
    %28 = vector.shape_cast %24 : vector<16x1xi1> to vector<16x1xi1>
    %29 = vector.broadcast %28 : vector<16x1xi1> to vector<16x128xi1>
    %30 = vector.shape_cast %27 : vector<1x128xf32> to vector<1x128xf32>
    %31 = vector.broadcast %30 : vector<1x128xf32> to vector<16x128xf32>
    %32 = arith.select %29, %31, %22 : vector<16x128xi1>, vector<16x128xf32>
    %c3_i32 = arith.constant 3 : i32
    %33 = vector.broadcast %c3_i32 : i32 to vector<16x1xi32>
    %34 = arith.cmpi eq, %0, %33 : vector<16x1xi32>
    %35 = vector.extract_strided_slice %1 {offsets = [3, 0], sizes = [1, 128], strides = [1, 1]} : vector<8x128xf32> to vector<1x128xf32>
    %36 = vector.shape_cast %35 : vector<1x128xf32> to vector<128xf32>
    %37 = vector.shape_cast %36 : vector<128xf32> to vector<1x128xf32>
    %38 = vector.shape_cast %34 : vector<16x1xi1> to vector<16x1xi1>
    %39 = vector.broadcast %38 : vector<16x1xi1> to vector<16x128xi1>
    %40 = vector.shape_cast %37 : vector<1x128xf32> to vector<1x128xf32>
    %41 = vector.broadcast %40 : vector<1x128xf32> to vector<16x128xf32>
    %42 = arith.select %39, %41, %32 : vector<16x128xi1>, vector<16x128xf32>
    %c4_i32 = arith.constant 4 : i32
    %43 = vector.broadcast %c4_i32 : i32 to vector<16x1xi32>
    %44 = arith.cmpi eq, %0, %43 : vector<16x1xi32>
    %45 = vector.extract_strided_slice %1 {offsets = [4, 0], sizes = [1, 128], strides = [1, 1]} : vector<8x128xf32> to vector<1x128xf32>
    %46 = vector.shape_cast %45 : vector<1x128xf32> to vector<128xf32>
    %47 = vector.shape_cast %46 : vector<128xf32> to vector<1x128xf32>
    %48 = vector.shape_cast %44 : vector<16x1xi1> to vector<16x1xi1>
    %49 = vector.broadcast %48 : vector<16x1xi1> to vector<16x128xi1>
    %50 = vector.shape_cast %47 : vector<1x128xf32> to vector<1x128xf32>
    %51 = vector.broadcast %50 : vector<1x128xf32> to vector<16x128xf32>
    %52 = arith.select %49, %51, %42 : vector<16x128xi1>, vector<16x128xf32>
    %c5_i32 = arith.constant 5 : i32
    %53 = vector.broadcast %c5_i32 : i32 to vector<16x1xi32>
    %54 = arith.cmpi eq, %0, %53 : vector<16x1xi32>
    %55 = vector.extract_strided_slice %1 {offsets = [5, 0], sizes = [1, 128], strides = [1, 1]} : vector<8x128xf32> to vector<1x128xf32>
    %56 = vector.shape_cast %55 : vector<1x128xf32> to vector<128xf32>
    %57 = vector.shape_cast %56 : vector<128xf32> to vector<1x128xf32>
    %58 = vector.shape_cast %54 : vector<16x1xi1> to vector<16x1xi1>
    %59 = vector.broadcast %58 : vector<16x1xi1> to vector<16x128xi1>
    %60 = vector.shape_cast %57 : vector<1x128xf32> to vector<1x128xf32>
    %61 = vector.broadcast %60 : vector<1x128xf32> to vector<16x128xf32>
    %62 = arith.select %59, %61, %52 : vector<16x128xi1>, vector<16x128xf32>
    %c6_i32 = arith.constant 6 : i32
    %63 = vector.broadcast %c6_i32 : i32 to vector<16x1xi32>
    %64 = arith.cmpi eq, %0, %63 : vector<16x1xi32>
    %65 = vector.extract_strided_slice %1 {offsets = [6, 0], sizes = [1, 128], strides = [1, 1]} : vector<8x128xf32> to vector<1x128xf32>
    %66 = vector.shape_cast %65 : vector<1x128xf32> to vector<128xf32>
    %67 = vector.shape_cast %66 : vector<128xf32> to vector<1x128xf32>
    %68 = vector.shape_cast %64 : vector<16x1xi1> to vector<16x1xi1>
    %69 = vector.broadcast %68 : vector<16x1xi1> to vector<16x128xi1>
    %70 = vector.shape_cast %67 : vector<1x128xf32> to vector<1x128xf32>
    %71 = vector.broadcast %70 : vector<1x128xf32> to vector<16x128xf32>
    %72 = arith.select %69, %71, %62 : vector<16x128xi1>, vector<16x128xf32>
    %c7_i32 = arith.constant 7 : i32
    %73 = vector.broadcast %c7_i32 : i32 to vector<16x1xi32>
    %74 = arith.cmpi eq, %0, %73 : vector<16x1xi32>
    %75 = vector.extract_strided_slice %1 {offsets = [7, 0], sizes = [1, 128], strides = [1, 1]} : vector<8x128xf32> to vector<1x128xf32>
    %76 = vector.shape_cast %75 : vector<1x128xf32> to vector<128xf32>
    %77 = vector.shape_cast %76 : vector<128xf32> to vector<1x128xf32>
    %78 = vector.shape_cast %74 : vector<16x1xi1> to vector<16x1xi1>
    %79 = vector.broadcast %78 : vector<16x1xi1> to vector<16x128xi1>
    %80 = vector.shape_cast %77 : vector<1x128xf32> to vector<1x128xf32>
    %81 = vector.broadcast %80 : vector<1x128xf32> to vector<16x128xf32>
    %82 = arith.select %79, %81, %72 : vector<16x128xi1>, vector<16x128xf32>
    %c0_3 = arith.constant 0 : index
    %c0_4 = arith.constant 0 : index
    %83 = vector.load %arg3[%c0_3, %c0_4] : memref<16x128xf32, #tpu.memory_space<vmem>>, vector<16x128xf32>
    tpu.vector_store %arg3[%c0_3, %c0_4], %82 {strides = array<i32>} : memref<16x128xf32, #tpu.memory_space<vmem>>, vector<16x128xf32>,
    return
  }
  func.func @transform_0(%arg0: i32) -> (i32, i32) {
    %c0_i32 = arith.constant 0 : i32
    %c0_i32_0 = arith.constant 0 : i32
    return %arg0, %c0_i32 : i32, i32
  }
  func.func @transform_1(%arg0: i32) -> (i32, i32) {
    %c0_i32 = arith.constant 0 : i32
    %c0_i32_0 = arith.constant 0 : i32
    %c0_i32_1 = arith.constant 0 : i32
    return %c0_i32, %c0_i32_0 : i32, i32
  }
  func.func @transform_2(%arg0: i32) -> (i32, i32) {
    %c0_i32 = arith.constant 0 : i32
    %c0_i32_0 = arith.constant 0 : i32
    return %arg0, %c0_i32 : i32, i32
  }
}

module attributes {stable_mosaic.version = 11 : i64} {
  func.func @prompt_embedding_kernel(%arg0: i32, %arg1: memref<16x1xi32, #tpu.memory_space<vmem>>, %arg2: memref<8x128xf32, #tpu.memory_space<vmem>>, %arg3: memref<16x128xf32, #tpu.memory_space<vmem>>) attributes {dimension_semantics = [#tpu.dimension_semantics<parallel>], iteration_bounds = array<i64: 1>, scalar_prefetch = 0 : i64, scratch_operands = 0 : i64, tpu.core_type = #tpu.core_type<tc>, window_params = [{transform_indices = @transform_0, window_bounds = array<i64: 16, 1>}, {pipeline_mode = #tpu.pipeline_mode<synchronous>, transform_indices = @transform_1, window_bounds = array<i64: 8, 128>}, {transform_indices = @transform_2, window_bounds = array<i64: 16, 128>}]} {
    %c0 = arith.constant 0 : index
    %c0_0 = arith.constant 0 : index
    %0 = vector.load %arg1[%c0, %c0_0] : memref<16x1xi32, #tpu.memory_space<vmem>>, vector<16x1xi32>
    %c0_1 = arith.constant 0 : index
    %c0_2 = arith.constant 0 : index
    %1 = vector.load %arg2[%c0_1, %c0_2] : memref<8x128xf32, #tpu.memory_space<vmem>>, vector<8x128xf32>
    %cst = arith.constant 0.000000e+00 : f32
    %2 = vector.broadcast %cst : f32 to vector<16x128xf32>
    %c0_i32 = arith.constant 0 : i32
    %3 = vector.broadcast %c0_i32 : i32 to vector<16x1xi32>
    %4 = arith.cmpi eq, %0, %3 : vector<16x1xi32>
    %5 = vector.extract_strided_slice %1 {offsets = [0, 0], sizes = [1, 128], strides = [1, 1]} : vector<8x128xf32> to vector<1x128xf32>
    %6 = vector.shape_cast %5 : vector<1x128xf32> to vector<128xf32>
    %7 = vector.shape_cast %6 : vector<128xf32> to vector<1x128xf32>
    %8 = vector.shape_cast %4 : vector<16x1xi1> to vector<16x1xi1>
    %9 = vector.broadcast %8 : vector<16x1xi1> to vector<16x128xi1>
    %10 = vector.shape_cast %7 : vector<1x128xf32> to vector<1x128xf32>
    %11 = vector.broadcast %10 : vector<1x128xf32> to vector<16x128xf32>
    %12 = arith.select %9, %11, %2 : vector<16x128xi1>, vector<16x128xf32>
    %c1_i32 = arith.constant 1 : i32
    %13 = vector.broadcast %c1_i32 : i32 to vector<16x1xi32>
    %14 = arith.cmpi eq, %0, %13 : vector<16x1xi32>
    %15 = vector.extract_strided_slice %1 {offsets = [1, 0], sizes = [1, 128], strides = [1, 1]} : vector<8x128xf32> to vector<1x128xf32>
    %16 = vector.shape_cast %15 : vector<1x128xf32> to vector<128xf32>
    %17 = vector.shape_cast %16 : vector<128xf32> to vector<1x128xf32>
    %18 = vector.shape_cast %14 : vector<16x1xi1> to vector<16x1xi1>
    %19 = vector.broadcast %18 : vector<16x1xi1> to vector<16x128xi1>
    %20 = vector.shape_cast %17 : vector<1x128xf32> to vector<1x128xf32>
    %21 = vector.broadcast %20 : vector<1x128xf32> to vector<16x128xf32>
    %22 = arith.select %19, %21, %12 : vector<16x128xi1>, vector<16x128xf32>
    %c2_i32 = arith.constant 2 : i32
    %23 = vector.broadcast %c2_i32 : i32 to vector<16x1xi32>
    %24 = arith.cmpi eq, %0, %23 : vector<16x1xi32>
    %25 = vector.extract_strided_slice %1 {offsets = [2, 0], sizes = [1, 128], strides = [1, 1]} : vector<8x128xf32> to vector<1x128xf32>
    %26 = vector.shape_cast %25 : vector<1x128xf32> to vector<128xf32>
    %27 = vector.shape_cast %26 : vector<128xf32> to vector<1x128xf32>
    %28 = vector.shape_cast %24 : vector<16x1xi1> to vector<16x1xi1>
    %29 = vector.broadcast %28 : vector<16x1xi1> to vector<16x128xi1>
    %30 = vector.shape_cast %27 : vector<1x128xf32> to vector<1x128xf32>
    %31 = vector.broadcast %30 : vector<1x128xf32> to vector<16x128xf32>
    %32 = arith.select %29, %31, %22 : vector<16x128xi1>, vector<16x128xf32>
    %c3_i32 = arith.constant 3 : i32
    %33 = vector.broadcast %c3_i32 : i32 to vector<16x1xi32>
    %34 = arith.cmpi eq, %0, %33 : vector<16x1xi32>
    %35 = vector.extract_strided_slice %1 {offsets = [3, 0], sizes = [1, 128], strides = [1, 1]} : vector<8x128xf32> to vector<1x128xf32>
    %36 = vector.shape_cast %35 : vector<1x128xf32> to vector<128xf32>
    %37 = vector.shape_cast %36 : vector<128xf32> to vector<1x128xf32>
    %38 = vector.shape_cast %34 : vector<16x1xi1> to vector<16x1xi1>
    %39 = vector.broadcast %38 : vector<16x1xi1> to vector<16x128xi1>
    %40 = vector.shape_cast %37 : vector<1x128xf32> to vector<1x128xf32>
    %41 = vector.broadcast %40 : vector<1x128xf32> to vector<16x128xf32>
    %42 = arith.select %39, %41, %32 : vector<16x128xi1>, vector<16x128xf32>
    %c4_i32 = arith.constant 4 : i32
    %43 = vector.broadcast %c4_i32 : i32 to vector<16x1xi32>
    %44 = arith.cmpi eq, %0, %43 : vector<16x1xi32>
    %45 = vector.extract_strided_slice %1 {offsets = [4, 0], sizes = [1, 128], strides = [1, 1]} : vector<8x128xf32> to vector<1x128xf32>
    %46 = vector.shape_cast %45 : vector<1x128xf32> to vector<128xf32>
    %47 = vector.shape_cast %46 : vector<128xf32> to vector<1x128xf32>
    %48 = vector.shape_cast %44 : vector<16x1xi1> to vector<16x1xi1>
    %49 = vector.broadcast %48 : vector<16x1xi1> to vector<16x128xi1>
    %50 = vector.shape_cast %47 : vector<1x128xf32> to vector<1x128xf32>
    %51 = vector.broadcast %50 : vector<1x128xf32> to vector<16x128xf32>
    %52 = arith.select %49, %51, %42 : vector<16x128xi1>, vector<16x128xf32>
    %c5_i32 = arith.constant 5 : i32
    %53 = vector.broadcast %c5_i32 : i32 to vector<16x1xi32>
    %54 = arith.cmpi eq, %0, %53 : vector<16x1xi32>
    %55 = vector.extract_strided_slice %1 {offsets = [5, 0], sizes = [1, 128], strides = [1, 1]} : vector<8x128xf32> to vector<1x128xf32>
    %56 = vector.shape_cast %55 : vector<1x128xf32> to vector<128xf32>
    %57 = vector.shape_cast %56 : vector<128xf32> to vector<1x128xf32>
    %58 = vector.shape_cast %54 : vector<16x1xi1> to vector<16x1xi1>
    %59 = vector.broadcast %58 : vector<16x1xi1> to vector<16x128xi1>
    %60 = vector.shape_cast %57 : vector<1x128xf32> to vector<1x128xf32>
    %61 = vector.broadcast %60 : vector<1x128xf32> to vector<16x128xf32>
    %62 = arith.select %59, %61, %52 : vector<16x128xi1>, vector<16x128xf32>
    %c6_i32 = arith.constant 6 : i32
    %63 = vector.broadcast %c6_i32 : i32 to vector<16x1xi32>
    %64 = arith.cmpi eq, %0, %63 : vector<16x1xi32>
    %65 = vector.extract_strided_slice %1 {offsets = [6, 0], sizes = [1, 128], strides = [1, 1]} : vector<8x128xf32> to vector<1x128xf32>
    %66 = vector.shape_cast %65 : vector<1x128xf32> to vector<128xf32>
    %67 = vector.shape_cast %66 : vector<128xf32> to vector<1x128xf32>
    %68 = vector.shape_cast %64 : vector<16x1xi1> to vector<16x1xi1>
    %69 = vector.broadcast %68 : vector<16x1xi1> to vector<16x128xi1>
    %70 = vector.shape_cast %67 : vector<1x128xf32> to vector<1x128xf32>
    %71 = vector.broadcast %70 : vector<1x128xf32> to vector<16x128xf32>
    %72 = arith.select %69, %71, %62 : vector<16x128xi1>, vector<16x128xf32>
    %c7_i32 = arith.constant 7 : i32
    %73 = vector.broadcast %c7_i32 : i32 to vector<16x1xi32>
    %74 = arith.cmpi eq, %0, %73 : vector<16x1xi32>
    %75 = vector.extract_strided_slice %1 {offsets = [7, 0], sizes = [1, 128], strides = [1, 1]} : vector<8x128xf32> to vector<1x128xf32>
    %76 = vector.shape_cast %75 : vector<1x128xf32> to vector<128xf32>
    %77 = vector.shape_cast %76 : vector<128xf32> to vector<1x128xf32>
    %78 = vector.shape_cast %74 : vector<16x1xi1> to vector<16x1xi1>
    %79 = vector.broadcast %78 : vector<16x1xi1> to vector<16x128xi1>
    %80 = vector.shape_cast %77 : vector<1x128xf32> to vector<1x128xf32>
    %81 = vector.broadcast %80 : vector<1x128xf32> to vector<16x128xf32>
    %82 = arith.select %79, %81, %72 : vector<16x128xi1>, vector<16x128xf32>
    %c0_3 = arith.constant 0 : index
    %c0_4 = arith.constant 0 : index
    %83 = vector.load %arg3[%c0_3, %c0_4] : memref<16x128xf32, #tpu.memory_space<vmem>>, vector<16x128xf32>
    tpu.vector_store %arg3[%c0_3, %c0_4], %82 {strides = array<i32>} : memref<16x128xf32, #tpu.memory_space<vmem>>, vector<16x128xf32>,
    return
  }
  func.func @transform_0(%arg0: i32) -> (i32, i32) {
    %c0_i32 = arith.constant 0 : i32
    %c0_i32_0 = arith.constant 0 : i32
    return %arg0, %c0_i32 : i32, i32
  }
  func.func @transform_1(%arg0: i32) -> (i32, i32) {
    %c0_i32 = arith.constant 0 : i32
    %c0_i32_0 = arith.constant 0 : i32
    %c0_i32_1 = arith.constant 0 : i32
    return %c0_i32, %c0_i32_0 : i32, i32
  }
  func.func @transform_2(%arg0: i32) -> (i32, i32) {
    %c0_i32 = arith.constant 0 : i32
    %c0_i32_0 = arith.constant 0 : i32
    return %arg0, %c0_i32 : i32, i32
  }
}

</mosaic_0001>

<bundles_post_ra>
// kernel: tpu_custom_call.1
= control target key start
LH: loop header
LB: loop body
LE: loop exit
PB: predicated region body
PF: predicated region fallthrough
CT: control target
= control target key end

     0   :  { %s219_s0 = inlined_call_operand.vmem [shape: s32[16,1], index: 0, kind: input, shape index: {}]   ;;  %s220_s1 = inlined_call_operand.vmem [shape: f32[8,128], index: 1, kind: input, shape index: {}]   ;;  %s221_s2 = inlined_call_operand.hbm [shape: f32[16,128], index: 2, kind: output, shape index: {}]  }
   0x1   :  { %v12_v0 = vld [vmem:[%s219_s0] sm:$0xff] }
   0x2   :  { %7 = vsyncpa [#allocation3], 0  ;;  %v188_v1 = vmov 0   ;;  %vm45_vm0 = vcmp.eq.s32.totalorder %v12_v0, 2  ;;  %vm30_vm1 = vcmp.eq.s32.totalorder %v12_v0, 1  ;;  %vm15_vm2 = vcmp.eq.s32.totalorder %v12_v0, 0 }
   0x3   :  { %161 = vset.pattern.permute.xlu2 %v188_v1  ;;  %160 = vset.pattern.permute.xlu1 %v188_v1  ;;  %v47_v2 = vsel %vm45_vm0, 1, %v188_v1  ;;  %v32_v3 = vsel %vm30_vm1, 1, %v188_v1  ;;  %v17_v4 = vsel %vm15_vm2, 1, %v188_v1  ;;  %v13_v5 = vld [vmem:[%s219_s0 + $0x8] sm:$0xff]  ;;  %vm75_vm6 = vcmp.eq.s32.totalorder %v12_v0, 4  ;;  %v14_v26 = vld [vmem:[%s220_s1] sm:$0xff] }
   0x4   :  { %159 = vset.pattern.permute.xlu0 %v188_v1  ;;  %50 = vperm.xlu2 %161, %v47_v2   ;;  %vm46_vm3 = vcmp.eq.s32.totalorder %v13_v5, 2  ;;  %vm31_vm4 = vcmp.eq.s32.totalorder %v13_v5, 1  ;;  %vm16_vm5 = vcmp.eq.s32.totalorder %v13_v5, 0  ;;  %vm61_vm7 = vcmp.eq.s32.totalorder %v13_v5, 3  ;;  %s189_s1 = smov [#allocation2]   ;;  %s143_s17 = sshll.u32 %s221_s2, 4  ;;  %s144_s17 = int_to_ptr.hbm [resolvable:$true] %s143_s17 }
   0x5   :  { %35 = vperm.xlu1 %160, %v32_v3   ;;  %20 = vperm.xlu0 %159, %v17_v4   ;;  %v48_v6 = vsel %vm46_vm3, 1, %v188_v1  ;;  %v33_v7 = vsel %vm31_vm4, 1, %v188_v1  ;;  %v18_v8 = vsel %vm16_vm5, 1, %v188_v1  ;;  %vm60_vm8 = vcmp.eq.s32.totalorder %v12_v0, 3  ;;  %s141_s14 = sshll.u32 %s189_s1, 4  ;;  %s190_s18 = smov 128   ;;  %s142_s14 = int_to_ptr.vmem [resolvable:$true] %s141_s14 }
   0x6   :  { %v77_v9 = vsel %vm75_vm6, 1, %v188_v1  ;;  %v63_v10 = vsel %vm61_vm7, 1, %v188_v1  ;;  %v62_v11 = vsel %vm60_vm8, 1, %v188_v1  ;;  %vm91_vm9 = vcmp.eq.s32.totalorder %v13_v5, 5  ;;  %s191_s19 = smov 8  }
   0x7   :  { %vm90_vm10 = vcmp.eq.s32.totalorder %v12_v0, 5  ;;  %vm76_vm11 = vcmp.eq.s32.totalorder %v13_v5, 4  ;;  %v93_v12 = vsel %vm91_vm9, 1, %v188_v1  ;;  %vm120_vm12 = vcmp.eq.s32.totalorder %v12_v0, 7 }
   0x8   :  { %v92_v13 = vsel %vm90_vm10, 1, %v188_v1  ;;  %v78_v14 = vsel %vm76_vm11, 1, %v188_v1  ;;  %vm106_vm13 = vcmp.eq.s32.totalorder %v13_v5, 6  ;;  %vm105_vm14 = vcmp.eq.s32.totalorder %v12_v0, 6 }
   0x9   :  { %v122_v15 = vsel %vm120_vm12, 1, %v188_v1  ;;  %v108_v16 = vsel %vm106_vm13, 1, %v188_v1  ;;  %v107_v17 = vsel %vm105_vm14, 1, %v188_v1  ;;  %vm121_vm15 = vcmp.eq.s32.totalorder %v13_v5, 7 }
   0xa   :  { %v123_v18 = vsel %vm121_vm15, 1, %v188_v1  ;;  %v27_v29 = vperm.slane %v14_v26, 0  ;;  %v42_v31 = vperm.slane %v14_v26, 1  ;;  %v57_v33 = vperm.slane %v14_v26, 2 }
   0xb   :  { %v72_v36 = vperm.slane %v14_v26, 3  ;;  %v87_v39 = vperm.slane %v14_v26, 4  ;;  %v102_v42 = vperm.slane %v14_v26, 5  ;;  %v117_v43 = vperm.slane %v14_v26, 6 }
   0xc   :  { %53 = vperm.xlu2 %161, %v48_v6   ;;  %v132_v45 = vperm.slane %v14_v26, 7 }
   0xd   :  { %38 = vperm.xlu1 %160, %v33_v7   ;;  %23 = vperm.xlu0 %159, %v18_v8  }
  0x14   :  { %80 = vperm.xlu2 %161, %v77_v9  }
  0x15   :  { %68 = vperm.xlu1 %160, %v63_v10   ;;  %65 = vperm.xlu0 %159, %v62_v11  }
  0x1c   :  { %98 = vperm.xlu2 %161, %v93_v12  }
  0x1d   :  { %95 = vperm.xlu1 %160, %v92_v13   ;;  %83 = vperm.xlu0 %159, %v78_v14  }
  0x24   :  { %125 = vperm.xlu2 %161, %v122_v15  }
  0x25   :  { %113 = vperm.xlu1 %160, %v108_v16   ;;  %110 = vperm.xlu0 %159, %v107_v17  }
  0x2d   :  { %128 = vperm.xlu0 %159, %v123_v18  }
  0x5e   :  { %v51_v19 = vpop.permute.xlu2 %50 }
  0x5f   :  { %vm55_vm2 = vcmp.eq.s32.totalorder %v51_v19, 1 }
  0x66   :  { %v54_v22 = vpop.permute.xlu2 %53 }
  0x67   :  { %vm56_vm10 = vcmp.eq.s32.totalorder %v54_v22, 1 }
  0x6e   :  { %v81_v25 = vpop.permute.xlu2 %80 }
  0x6f   :  { %vm85_vm7 = vcmp.eq.s32.totalorder %v81_v25, 1 }
  0x76   :  { %v99_v30 = vpop.permute.xlu2 %98 }
  0x77   :  { %v36_v20 = vpop.permute.xlu1 %35  ;;  %v21_v21 = vpop.permute.xlu0 %20  ;;  %vm101_vm14 = vcmp.eq.s32.totalorder %v99_v30, 1 }
  0x78   :  { %vm25_vm0 = vcmp.eq.s32.totalorder %v21_v21, 1  ;;  %vm40_vm1 = vcmp.eq.s32.totalorder %v36_v20, 1 }
  0x79   :  { %v28_v32 = vsel %vm25_vm0, %v27_v29, 0.0 }
  0x7a   :  { %v43_v35 = vsel %vm40_vm1, %v42_v31, %v28_v32 }
  0x7b   :  { %v58_v38 = vsel %vm55_vm2, %v57_v33, %v43_v35 }
  0x7e   :  { %v126_v44 = vpop.permute.xlu2 %125 }
  0x7f   :  { %v39_v23 = vpop.permute.xlu1 %38  ;;  %v24_v24 = vpop.permute.xlu0 %23  ;;  %vm130_vm11 = vcmp.eq.s32.totalorder %v126_v44, 1 }
  0x80   :  { %vm26_vm3 = vcmp.eq.s32.totalorder %v24_v24, 1  ;;  %vm41_vm5 = vcmp.eq.s32.totalorder %v39_v23, 1 }
  0x81   :  { %v29_v40 = vsel %vm26_vm3, %v27_v29, 0.0 }
  0x82   :  { %v44_v46 = vsel %vm41_vm5, %v42_v31, %v29_v40 }
  0x83   :  { %v59_v51 = vsel %vm56_vm10, %v57_v33, %v44_v46 }
  0x87   :  { %v69_v27 = vpop.permute.xlu1 %68  ;;  %v66_v28 = vpop.permute.xlu0 %65 }
  0x88   :  { %vm70_vm4 = vcmp.eq.s32.totalorder %v66_v28, 1  ;;  %vm71_vm8 = vcmp.eq.s32.totalorder %v69_v27, 1 }
  0x89   :  { %v73_v41 = vsel %vm70_vm4, %v72_v36, %v58_v38  ;;  %v74_v54 = vsel %vm71_vm8, %v72_v36, %v59_v51 }
  0x8a   :  { %v88_v47 = vsel %vm85_vm7, %v87_v39, %v73_v41 }
  0x8f   :  { %v84_v34 = vpop.permute.xlu0 %83  ;;  %v96_v37 = vpop.permute.xlu1 %95 }
  0x90   :  { %vm100_vm6 = vcmp.eq.s32.totalorder %v96_v37, 1  ;;  %vm86_vm12 = vcmp.eq.s32.totalorder %v84_v34, 1 }
  0x91   :  { %v103_v49 = vsel %vm100_vm6, %v102_v42, %v88_v47  ;;  %v89_v55 = vsel %vm86_vm12, %v87_v39, %v74_v54 }
  0x92   :  { %v104_v56 = vsel %vm101_vm14, %v102_v42, %v89_v55 }
  0x97   :  { %v111_v48 = vpop.permute.xlu0 %110  ;;  %v114_v52 = vpop.permute.xlu1 %113 }
  0x98   :  { %vm115_vm9 = vcmp.eq.s32.totalorder %v111_v48, 1  ;;  %vm116_vm13 = vcmp.eq.s32.totalorder %v114_v52, 1 }
  0x99   :  { %v118_v50 = vsel %vm115_vm9, %v117_v43, %v103_v49  ;;  %v119_v58 = vsel %vm116_vm13, %v117_v43, %v104_v56 }
  0x9a   :  { %v133_v53 = vsel %vm130_vm11, %v132_v45, %v118_v50 }
  0x9b   :  { %135 = vst [vmem:[#allocation2] sm:$0xff] %v133_v53 }
  0x9f   :  { %v129_v57 = vpop.permute.xlu0 %128 }
  0xa0   :  { %vm131_vm15 = vcmp.eq.s32.totalorder %v129_v57, 1 }
  0xa1   :  { %v134_v59 = vsel %vm131_vm15, %v132_v45, %v119_v58 }
  0xa2   :  { %136 = vst [vmem:[#allocation2 + $0x8] sm:$0xff] %v134_v59 }
  0xa3   :  { %149 = dma.vmem_to_hbm [thread:$0]  %s142_s14, 256, %s144_s17, [#allocation3], %s190_s18, %s190_s18, %s191_s19  }
  0xa4   :  { %186 = dma.done.wait [#allocation3], 256  }
  0xa5   :  { %187 = vsyncadd [#allocation3], 4294967040 }
  0xa6   :  { %154 = vsyncpa [#allocation3], 1 }

// kernel: tpu_custom_call.1
= control target key start
LH: loop header
LB: loop body
LE: loop exit
PB: predicated region body
PF: predicated region fallthrough
CT: control target
= control target key end

     0   :  { %s219_s0 = inlined_call_operand.vmem [shape: s32[16,1], index: 0, kind: input, shape index: {}]   ;;  %s220_s1 = inlined_call_operand.vmem [shape: f32[8,128], index: 1, kind: input, shape index: {}]   ;;  %s221_s2 = inlined_call_operand.hbm [shape: f32[16,128], index: 2, kind: output, shape index: {}]  }
   0x1   :  { %v12_v0 = vld [vmem:[%s219_s0] sm:$0xff] }
   0x2   :  { %7 = vsyncpa [#allocation3], 0  ;;  %v188_v1 = vmov 0   ;;  %vm45_vm0 = vcmp.eq.s32.totalorder %v12_v0, 2  ;;  %vm30_vm1 = vcmp.eq.s32.totalorder %v12_v0, 1  ;;  %vm15_vm2 = vcmp.eq.s32.totalorder %v12_v0, 0 }
   0x3   :  { %161 = vset.pattern.permute.xlu2 %v188_v1  ;;  %160 = vset.pattern.permute.xlu1 %v188_v1  ;;  %v47_v2 = vsel %vm45_vm0, 1, %v188_v1  ;;  %v32_v3 = vsel %vm30_vm1, 1, %v188_v1  ;;  %v17_v4 = vsel %vm15_vm2, 1, %v188_v1  ;;  %v13_v5 = vld [vmem:[%s219_s0 + $0x8] sm:$0xff]  ;;  %vm75_vm6 = vcmp.eq.s32.totalorder %v12_v0, 4  ;;  %v14_v26 = vld [vmem:[%s220_s1] sm:$0xff] }
   0x4   :  { %159 = vset.pattern.permute.xlu0 %v188_v1  ;;  %50 = vperm.xlu2 %161, %v47_v2   ;;  %vm46_vm3 = vcmp.eq.s32.totalorder %v13_v5, 2  ;;  %vm31_vm4 = vcmp.eq.s32.totalorder %v13_v5, 1  ;;  %vm16_vm5 = vcmp.eq.s32.totalorder %v13_v5, 0  ;;  %vm61_vm7 = vcmp.eq.s32.totalorder %v13_v5, 3  ;;  %s189_s1 = smov [#allocation2]   ;;  %s143_s17 = sshll.u32 %s221_s2, 4  ;;  %s144_s17 = int_to_ptr.hbm [resolvable:$true] %s143_s17 }
   0x5   :  { %35 = vperm.xlu1 %160, %v32_v3   ;;  %20 = vperm.xlu0 %159, %v17_v4   ;;  %v48_v6 = vsel %vm46_vm3, 1, %v188_v1  ;;  %v33_v7 = vsel %vm31_vm4, 1, %v188_v1  ;;  %v18_v8 = vsel %vm16_vm5, 1, %v188_v1  ;;  %vm60_vm8 = vcmp.eq.s32.totalorder %v12_v0, 3  ;;  %s141_s14 = sshll.u32 %s189_s1, 4  ;;  %s190_s18 = smov 128   ;;  %s142_s14 = int_to_ptr.vmem [resolvable:$true] %s141_s14 }
   0x6   :  { %v77_v9 = vsel %vm75_vm6, 1, %v188_v1  ;;  %v63_v10 = vsel %vm61_vm7, 1, %v188_v1  ;;  %v62_v11 = vsel %vm60_vm8, 1, %v188_v1  ;;  %vm91_vm9 = vcmp.eq.s32.totalorder %v13_v5, 5  ;;  %s191_s19 = smov 8  }
   0x7   :  { %vm90_vm10 = vcmp.eq.s32.totalorder %v12_v0, 5  ;;  %vm76_vm11 = vcmp.eq.s32.totalorder %v13_v5, 4  ;;  %v93_v12 = vsel %vm91_vm9, 1, %v188_v1  ;;  %vm120_vm12 = vcmp.eq.s32.totalorder %v12_v0, 7 }
   0x8   :  { %v92_v13 = vsel %vm90_vm10, 1, %v188_v1  ;;  %v78_v14 = vsel %vm76_vm11, 1, %v188_v1  ;;  %vm106_vm13 = vcmp.eq.s32.totalorder %v13_v5, 6  ;;  %vm105_vm14 = vcmp.eq.s32.totalorder %v12_v0, 6 }
   0x9   :  { %v122_v15 = vsel %vm120_vm12, 1, %v188_v1  ;;  %v108_v16 = vsel %vm106_vm13, 1, %v188_v1  ;;  %v107_v17 = vsel %vm105_vm14, 1, %v188_v1  ;;  %vm121_vm15 = vcmp.eq.s32.totalorder %v13_v5, 7 }
   0xa   :  { %v123_v18 = vsel %vm121_vm15, 1, %v188_v1  ;;  %v27_v29 = vperm.slane %v14_v26, 0  ;;  %v42_v31 = vperm.slane %v14_v26, 1  ;;  %v57_v33 = vperm.slane %v14_v26, 2 }
   0xb   :  { %v72_v36 = vperm.slane %v14_v26, 3  ;;  %v87_v39 = vperm.slane %v14_v26, 4  ;;  %v102_v42 = vperm.slane %v14_v26, 5  ;;  %v117_v43 = vperm.slane %v14_v26, 6 }
   0xc   :  { %53 = vperm.xlu2 %161, %v48_v6   ;;  %v132_v45 = vperm.slane %v14_v26, 7 }
   0xd   :  { %38 = vperm.xlu1 %160, %v33_v7   ;;  %23 = vperm.xlu0 %159, %v18_v8  }
  0x14   :  { %80 = vperm.xlu2 %161, %v77_v9  }
  0x15   :  { %68 = vperm.xlu1 %160, %v63_v10   ;;  %65 = vperm.xlu0 %159, %v62_v11  }
  0x1c   :  { %98 = vperm.xlu2 %161, %v93_v12  }
  0x1d   :  { %95 = vperm.xlu1 %160, %v92_v13   ;;  %83 = vperm.xlu0 %159, %v78_v14  }
  0x24   :  { %125 = vperm.xlu2 %161, %v122_v15  }
  0x25   :  { %113 = vperm.xlu1 %160, %v108_v16   ;;  %110 = vperm.xlu0 %159, %v107_v17  }
  0x2d   :  { %128 = vperm.xlu0 %159, %v123_v18  }
  0x5e   :  { %v51_v19 = vpop.permute.xlu2 %50 }
  0x5f   :  { %vm55_vm2 = vcmp.eq.s32.totalorder %v51_v19, 1 }
  0x66   :  { %v54_v22 = vpop.permute.xlu2 %53 }
  0x67   :  { %vm56_vm10 = vcmp.eq.s32.totalorder %v54_v22, 1 }
  0x6e   :  { %v81_v25 = vpop.permute.xlu2 %80 }
  0x6f   :  { %vm85_vm7 = vcmp.eq.s32.totalorder %v81_v25, 1 }
  0x76   :  { %v99_v30 = vpop.permute.xlu2 %98 }
  0x77   :  { %v36_v20 = vpop.permute.xlu1 %35  ;;  %v21_v21 = vpop.permute.xlu0 %20  ;;  %vm101_vm14 = vcmp.eq.s32.totalorder %v99_v30, 1 }
  0x78   :  { %vm25_vm0 = vcmp.eq.s32.totalorder %v21_v21, 1  ;;  %vm40_vm1 = vcmp.eq.s32.totalorder %v36_v20, 1 }
  0x79   :  { %v28_v32 = vsel %vm25_vm0, %v27_v29, 0.0 }
  0x7a   :  { %v43_v35 = vsel %vm40_vm1, %v42_v31, %v28_v32 }
  0x7b   :  { %v58_v38 = vsel %vm55_vm2, %v57_v33, %v43_v35 }
  0x7e   :  { %v126_v44 = vpop.permute.xlu2 %125 }
  0x7f   :  { %v39_v23 = vpop.permute.xlu1 %38  ;;  %v24_v24 = vpop.permute.xlu0 %23  ;;  %vm130_vm11 = vcmp.eq.s32.totalorder %v126_v44, 1 }
  0x80   :  { %vm26_vm3 = vcmp.eq.s32.totalorder %v24_v24, 1  ;;  %vm41_vm5 = vcmp.eq.s32.totalorder %v39_v23, 1 }
  0x81   :  { %v29_v40 = vsel %vm26_vm3, %v27_v29, 0.0 }
  0x82   :  { %v44_v46 = vsel %vm41_vm5, %v42_v31, %v29_v40 }
  0x83   :  { %v59_v51 = vsel %vm56_vm10, %v57_v33, %v44_v46 }
  0x87   :  { %v69_v27 = vpop.permute.xlu1 %68  ;;  %v66_v28 = vpop.permute.xlu0 %65 }
  0x88   :  { %vm70_vm4 = vcmp.eq.s32.totalorder %v66_v28, 1  ;;  %vm71_vm8 = vcmp.eq.s32.totalorder %v69_v27, 1 }
  0x89   :  { %v73_v41 = vsel %vm70_vm4, %v72_v36, %v58_v38  ;;  %v74_v54 = vsel %vm71_vm8, %v72_v36, %v59_v51 }
  0x8a   :  { %v88_v47 = vsel %vm85_vm7, %v87_v39, %v73_v41 }
  0x8f   :  { %v84_v34 = vpop.permute.xlu0 %83  ;;  %v96_v37 = vpop.permute.xlu1 %95 }
  0x90   :  { %vm100_vm6 = vcmp.eq.s32.totalorder %v96_v37, 1  ;;  %vm86_vm12 = vcmp.eq.s32.totalorder %v84_v34, 1 }
  0x91   :  { %v103_v49 = vsel %vm100_vm6, %v102_v42, %v88_v47  ;;  %v89_v55 = vsel %vm86_vm12, %v87_v39, %v74_v54 }
  0x92   :  { %v104_v56 = vsel %vm101_vm14, %v102_v42, %v89_v55 }
  0x97   :  { %v111_v48 = vpop.permute.xlu0 %110  ;;  %v114_v52 = vpop.permute.xlu1 %113 }
  0x98   :  { %vm115_vm9 = vcmp.eq.s32.totalorder %v111_v48, 1  ;;  %vm116_vm13 = vcmp.eq.s32.totalorder %v114_v52, 1 }
  0x99   :  { %v118_v50 = vsel %vm115_vm9, %v117_v43, %v103_v49  ;;  %v119_v58 = vsel %vm116_vm13, %v117_v43, %v104_v56 }
  0x9a   :  { %v133_v53 = vsel %vm130_vm11, %v132_v45, %v118_v50 }
  0x9b   :  { %135 = vst [vmem:[#allocation2] sm:$0xff] %v133_v53 }
  0x9f   :  { %v129_v57 = vpop.permute.xlu0 %128 }
  0xa0   :  { %vm131_vm15 = vcmp.eq.s32.totalorder %v129_v57, 1 }
  0xa1   :  { %v134_v59 = vsel %vm131_vm15, %v132_v45, %v119_v58 }
  0xa2   :  { %136 = vst [vmem:[#allocation2 + $0x8] sm:$0xff] %v134_v59 }
  0xa3   :  { %149 = dma.vmem_to_hbm [thread:$0]  %s142_s14, 256, %s144_s17, [#allocation3], %s190_s18, %s190_s18, %s191_s19  }
  0xa4   :  { %186 = dma.done.wait [#allocation3], 256  }
  0xa5   :  { %187 = vsyncadd [#allocation3], 4294967040 }
  0xa6   :  { %154 = vsyncpa [#allocation3], 1 }

</bundles_post_ra>
